<compile_context>
chip_gen: v5e
topology: v5e:2x2
jax: 0.10.0
libtpu: 0.0.40
codegen_flags: <defaults>
</compile_context>

<pallas_src>
import jax
import jax.numpy as jnp
from jax import lax
from jax.experimental import pallas as pl
from jax.experimental.pallas import tpu as pltpu


def _round_up(x: int, m: int) -> int:
    return ((x + m - 1) // m) * m


# Conservative per-step working-set target (fits every generation once the
# scoped limit below is applied) and the scoped-VMEM limit we request.
_VMEM_BUDGET = 24 * 1024 * 1024          # bytes of live buffers we plan for
_VMEM_LIMIT = 48 * 1024 * 1024           # < 64 MiB v7x physical, > v5e/v6e defaults


# ---------------------------------------------------------------------------
# Fast path: W (c_pad, d_pad) and bias are VMEM-resident, 1-D grid over rows.
# ---------------------------------------------------------------------------
def _fused_scores_kernel(x_ref, w_ref, b_ref, o_ref):
    # x_ref: (tm, d_pad), w_ref: (c_pad, d_pad) -> contract the last dim of
    # both operands directly on the MXU (transpose-free, f32 accumulation),
    # fold the bias into the single lane-dense store.
    o_ref[...] = (lax.dot_general(
        x_ref[...], w_ref[...],
        dimension_numbers=(((1,), (1,)), ((), ())),
        preferred_element_type=jnp.float32) + b_ref[...]).astype(o_ref.dtype)


# ---------------------------------------------------------------------------
# Fallback path: contraction axis tiled, f32 VMEM accumulator (huge C*D only).
# ---------------------------------------------------------------------------
def _tiled_scores_kernel(x_ref, w_ref, b_ref, o_ref, acc_ref):
    k = pl.program_id(1)

    @pl.when(k == 0)
    def _():
        # Fold the bias into the accumulator init (no separate epilogue add).
        acc_ref[...] = jnp.broadcast_to(b_ref[...], acc_ref.shape)

    acc_ref[...] += lax.dot_general(
        x_ref[...], w_ref[...],
        dimension_numbers=(((1,), (1,)), ((), ())),
        preferred_element_type=jnp.float32)

    @pl.when(k == pl.num_programs(1) - 1)
    def _():
        o_ref[...] = acc_ref[...].astype(o_ref.dtype)


def linear_decision_scores(x: jax.Array, weights: jax.Array,
                           biases: jax.Array) -> jax.Array:
    """Compute x @ weights.T + biases with a tiled Pallas TPU kernel.

    x: (N, D) float, weights: (C, D), biases: (C,).  Returns (N, C) float32.
    """
    N, D = x.shape
    C, Dw = weights.shape
    assert D == Dw, "feature dims must match"

    x_itemsize = jnp.dtype(x.dtype).itemsize
    c_pad = _round_up(max(C, 1), 128)         # lane-dense output tile
    d_pad128 = _round_up(max(D, 1), 128)      # pad features to 128 only

    # VMEM cost of keeping W resident (counted x2 for buffering headroom) and
    # per-row cost of double-buffered x tiles + output tiles.
    w_bytes = 2 * c_pad * d_pad128 * 4
    per_row = 2 * (d_pad128 * x_itemsize + c_pad * 4)

    if w_bytes + 8 * per_row <= _VMEM_BUDGET:
        # ---------------- fast path: resident W, collapsed contraction ------
        d_pad = d_pad128
        tm = ((_VMEM_BUDGET - w_bytes) // per_row) // 8 * 8
        tm = int(max(8, min(tm, 1024, _round_up(N, 8))))
        n_pad = _round_up(N, tm)

        # Only materialize a padded copy of x when the shape is misaligned.
        if (N, D) == (n_pad, d_pad):
            x_p = x
        else:
            x_p = jnp.zeros((n_pad, d_pad), x.dtype).at[:N, :D].set(x)
        w_p = jnp.zeros((c_pad, d_pad), weights.dtype).at[:C, :D].set(weights)
        b_p = jnp.zeros((1, c_pad), jnp.float32).at[0, :C].set(
            biases.astype(jnp.float32))

        out = pl.pallas_call(
            _fused_scores_kernel,
            out_shape=jax.ShapeDtypeStruct((n_pad, c_pad), jnp.float32),
            grid_spec=pltpu.PrefetchScalarGridSpec(
                num_scalar_prefetch=0,
                grid=(n_pad // tm,),
                in_specs=[
                    pl.BlockSpec((tm, d_pad), lambda i: (i, 0)),       # x tile
                    pl.BlockSpec((c_pad, d_pad), lambda i: (0, 0)),    # W (resident)
                    pl.BlockSpec((1, c_pad), lambda i: (0, 0)),        # bias (resident)
                ],
                out_specs=pl.BlockSpec((tm, c_pad), lambda i: (i, 0)),
            ),
            compiler_params=pltpu.CompilerParams(
                dimension_semantics=("parallel",),
                vmem_limit_bytes=_VMEM_LIMIT),
        )(x_p, w_p, b_p)
        return out[:N, :C]

    # ---------------- fallback: tile the contraction axis -------------------
    tk = 512 if D > 512 else d_pad128
    tm = 512 if N > 512 else _round_up(max(N, 1), 8)
    if c_pad > 1024:                 # keep acc/out tiles inside the budget
        tm = min(tm, 256)
    d_pad = _round_up(D, tk)
    n_pad = _round_up(N, tm)

    if (N, D) == (n_pad, d_pad):
        x_p = x
    else:
        x_p = jnp.zeros((n_pad, d_pad), x.dtype).at[:N, :D].set(x)
    w_p = jnp.zeros((c_pad, d_pad), weights.dtype).at[:C, :D].set(weights)
    b_p = jnp.zeros((1, c_pad), jnp.float32).at[0, :C].set(
        biases.astype(jnp.float32))

    out = pl.pallas_call(
        _tiled_scores_kernel,
        out_shape=jax.ShapeDtypeStruct((n_pad, c_pad), jnp.float32),
        grid_spec=pltpu.PrefetchScalarGridSpec(
            num_scalar_prefetch=0,
            grid=(n_pad // tm, d_pad // tk),
            in_specs=[
                pl.BlockSpec((tm, tk), lambda i, k: (i, k)),           # x tile
                pl.BlockSpec((c_pad, tk), lambda i, k: (0, k)),        # W tile
                pl.BlockSpec((1, c_pad), lambda i, k: (0, 0)),         # bias row
            ],
            out_specs=pl.BlockSpec((tm, c_pad), lambda i, k: (i, 0)),
            scratch_shapes=[pltpu.VMEM((tm, c_pad), jnp.float32)],
        ),
        compiler_params=pltpu.CompilerParams(
            dimension_semantics=("parallel", "arbitrary"),
            vmem_limit_bytes=_VMEM_LIMIT),
    )(x_p, w_p, b_p)
    return out[:N, :C]


# ---------------------------------------------------------------------------
# JAX port of TorchLinearClassifier (constructed from plain arrays instead of
# a fitted sklearn LinearModel).
# ---------------------------------------------------------------------------
class TorchLinearClassifier:
    def __init__(self, weights, biases, classes):
        # TODO(synk): the PyTorch ctor extracts coef_/intercept_/classes_ from
        # a fitted sklearn model; here the arrays are passed in directly.
        weights = jnp.asarray(weights, dtype=jnp.float32)
        if weights.ndim == 1:
            weights = weights[None]
        self.weights = weights                                       # (C, D)
        biases = jnp.atleast_1d(jnp.asarray(biases, dtype=jnp.float32))
        self.biases = jnp.broadcast_to(biases, (weights.shape[0],))  # (C,)
        self.classes = jnp.asarray(classes)

    def decision_function(self, x: jax.Array) -> jax.Array:
        scores = linear_decision_scores(x, self.weights, self.biases)
        if scores.shape[1] == 1:
            return scores.reshape(-1)
        return scores

    def predict(self, x: jax.Array) -> jax.Array:
        scores = self.decision_function(x)
        if scores.ndim == 1:
            indices = (scores > 0).astype(jnp.int32)
        else:
            indices = jnp.argmax(scores, axis=-1)
        return jnp.take(self.classes, indices)

    def __call__(self, x: jax.Array) -> jax.Array:
        return self.predict(x)


# ---------------------------------------------------------------------------
# Pure-JAX reference (mirrors the PyTorch forward) for correctness checking.
# ---------------------------------------------------------------------------
def _reference_predict(x, weights, biases, classes):
    scores = x @ weights.T + biases
    if scores.shape[1] == 1:
        scores = scores.reshape(-1)
        indices = (scores > 0).astype(jnp.int32)
    else:
        indices = jnp.argmax(scores, axis=-1)
    return classes[indices], scores


def _check_case(name, x, weights, biases, classes, ok):
    clf = TorchLinearClassifier(weights, biases, classes)
    preds = clf(x)
    scores = clf.decision_function(x)
    jax.block_until_ready(preds)
    jax.block_until_ready(scores)

    ref_preds, ref_scores = _reference_predict(x, weights, biases, classes)
    if not jnp.allclose(scores, ref_scores, rtol=1e-4, atol=1e-4):
        ok = False
        print(f"MISMATCH {name} scores: max abs err",
              float(jnp.max(jnp.abs(scores - ref_scores))))
    if not jnp.array_equal(preds, ref_preds):
        ok = False
        print(f"MISMATCH {name} predictions")
    return ok


if __name__ == "__main__":
    key = jax.random.PRNGKey(0)
    k_x, k_w, k_b, k_w2, k_b2, k_x3, k_w3, k_b3 = jax.random.split(key, 8)

    ok = True

    # --- multi-class case (N=8, D=32, C=3) -----------------------------------
    N, D, C = 8, 32, 3
    x = jax.random.normal(k_x, (N, D), dtype=jnp.float32)
    weights = jax.random.normal(k_w, (C, D), dtype=jnp.float32)
    biases = jax.random.normal(k_b, (C,), dtype=jnp.float32)
    classes = jnp.array([10, 20, 30], dtype=jnp.int32)
    ok = _check_case("multi-class", x, weights, biases, classes, ok)

    # --- binary case (C = 1, scores flattened, > 0 threshold) ----------------
    weights_b = jax.random.normal(k_w2, (1, D), dtype=jnp.float32)
    biases_b = jax.random.normal(k_b2, (1,), dtype=jnp.float32)
    classes_b = jnp.array([0, 1], dtype=jnp.int32)
    ok = _check_case("binary", x, weights_b, biases_b, classes_b, ok)

    # --- misaligned case (N=300, D=200, C=7): exercises the padding path -----
    N3, D3, C3 = 300, 200, 7
    x3 = jax.random.normal(k_x3, (N3, D3), dtype=jnp.float32)
    weights3 = jax.random.normal(k_w3, (C3, D3), dtype=jnp.float32)
    biases3 = jax.random.normal(k_b3, (C3,), dtype=jnp.float32)
    classes3 = jnp.arange(C3, dtype=jnp.int32) * 100
    ok = _check_case("misaligned", x3, weights3, biases3, classes3, ok)

    if ok:
        print("KERNEL_OK")
</pallas_src>

<mosaic_0001>
module attributes {stable_mosaic.version = 11 : i64} {
  func.func @_fused_scores_kernel(%arg0: i32, %arg1: memref<8x128xf32, #tpu.memory_space<vmem>>, %arg2: memref<128x128xf32, #tpu.memory_space<vmem>>, %arg3: memref<1x128xf32, #tpu.memory_space<vmem>>, %arg4: memref<8x128xf32, #tpu.memory_space<vmem>>) attributes {dimension_semantics = [#tpu.dimension_semantics<parallel>], iteration_bounds = array<i64: 1>, scalar_prefetch = 0 : i64, scratch_operands = 0 : i64, tpu.core_type = #tpu.core_type<tc>, window_params = [{transform_indices = @transform_0, window_bounds = array<i64: 8, 128>}, {pipeline_mode = #tpu.pipeline_mode<synchronous>, transform_indices = @transform_1, window_bounds = array<i64: 128, 128>}, {pipeline_mode = #tpu.pipeline_mode<synchronous>, transform_indices = @transform_2, window_bounds = array<i64: 1, 128>}, {transform_indices = @transform_3, window_bounds = array<i64: 8, 128>}]} {
    %c0 = arith.constant 0 : index
    %c0_0 = arith.constant 0 : index
    %0 = vector.load %arg1[%c0, %c0_0] : memref<8x128xf32, #tpu.memory_space<vmem>>, vector<8x128xf32>
    %c0_1 = arith.constant 0 : index
    %c0_2 = arith.constant 0 : index
    %1 = vector.load %arg2[%c0_1, %c0_2] : memref<128x128xf32, #tpu.memory_space<vmem>>, vector<128x128xf32>
    %cst = arith.constant dense<0.000000e+00> : vector<8x128xf32>
    %2 = tpu.matmul %0, %1, %cst {dimension_numbers = #tpu.dot_dimension_numbers<[1], [1], [0], [0], [0, 0, 1, 0], [], []>} : vector<8x128xf32>, vector<128x128xf32>, vector<8x128xf32> -> vector<8x128xf32>
    %c0_3 = arith.constant 0 : index
    %c0_4 = arith.constant 0 : index
    %3 = vector.load %arg3[%c0_3, %c0_4] : memref<1x128xf32, #tpu.memory_space<vmem>>, vector<1x128xf32>
    %4 = vector.broadcast %3 : vector<1x128xf32> to vector<8x128xf32>
    %5 = arith.addf %2, %4 : vector<8x128xf32>
    %c0_5 = arith.constant 0 : index
    %c0_6 = arith.constant 0 : index
    %6 = vector.load %arg4[%c0_5, %c0_6] : memref<8x128xf32, #tpu.memory_space<vmem>>, vector<8x128xf32>
    tpu.vector_store %arg4[%c0_5, %c0_6], %5 {strides = array<i32>} : memref<8x128xf32, #tpu.memory_space<vmem>>, vector<8x128xf32>,
    return
  }
  func.func @transform_0(%arg0: i32) -> (i32, i32) {
    %c0_i32 = arith.constant 0 : i32
    %c0_i32_0 = arith.constant 0 : i32
    return %arg0, %c0_i32 : i32, i32
  }
  func.func @transform_1(%arg0: i32) -> (i32, i32) {
    %c0_i32 = arith.constant 0 : i32
    %c0_i32_0 = arith.constant 0 : i32
    %c0_i32_1 = arith.constant 0 : i32
    return %c0_i32, %c0_i32_0 : i32, i32
  }
  func.func @transform_2(%arg0: i32) -> (i32, i32) {
    %c0_i32 = arith.constant 0 : i32
    %c0_i32_0 = arith.constant 0 : i32
    %c0_i32_1 = arith.constant 0 : i32
    return %c0_i32, %c0_i32_0 : i32, i32
  }
  func.func @transform_3(%arg0: i32) -> (i32, i32) {
    %c0_i32 = arith.constant 0 : i32
    %c0_i32_0 = arith.constant 0 : i32
    return %arg0, %c0_i32 : i32, i32
  }
}

</mosaic_0001>

<bundles_post_ra>
// kernel: tpu_custom_call.1
= control target key start
LH: loop header
LB: loop body
LE: loop exit
PB: predicated region body
PF: predicated region fallthrough
CT: control target
= control target key end

     0   :  { %8 = vsyncpa [#allocation3], 0  ;;  %s226_s0 = inlined_call_operand.hbm [shape: f32[8,128], index: 0, kind: input, shape index: {}]   ;;  %s227_s1 = inlined_call_operand.hbm [shape: f32[128,128], index: 1, kind: input, shape index: {}]   ;;  %s228_s2 = inlined_call_operand.vmem [shape: f32[1,128], index: 2, kind: input, shape index: {}]   ;;  %s229_s3 = inlined_call_operand.hbm [shape: f32[8,128], index: 3, kind: output, shape index: {}]  }
   0x1   :  { %9 = vsyncpa [#allocation6], 0 }
   0x2   :  { %10 = vsyncpa [#allocation4], 0  ;;  %s16_s14 = sshll.u32 %s226_s0, 4  ;;  %s189_s15 = smov [#allocation2]   ;;  %s17_s14 = int_to_ptr.hbm [resolvable:$true] %s16_s14 }
   0x3   :  { %s18_s16 = sshll.u32 %s189_s15, 4  ;;  %s26_s19 = sshll.u32 %s227_s1, 4  ;;  %s19_s16 = int_to_ptr.vmem [resolvable:$true] %s18_s16  ;;  %s27_s19 = int_to_ptr.hbm [resolvable:$true] %s26_s19 }
   0x4   :  { %21 = dma.hbm_to_vmem [thread:$0]  %s17_s14, 128, %s19_s16, [#allocation3]  }
   0x5   :  { %s190_s20 = smov [#allocation5]   ;;  %s191_s22 = smov 128  }
   0x6   :  { %s28_s21 = sshll.u32 %s190_s20, 4  ;;  %s192_s23 = smov 8   ;;  %s29_s21 = int_to_ptr.vmem [resolvable:$true] %s28_s21 }
   0x7   :  { %34 = dma.hbm_to_vmem [thread:$0]  %s27_s19, 2048, %s29_s21, [#allocation6], %s191_s22, %s191_s22, %s192_s23  }
   0x8   :  { %183 = dma.done.wait [#allocation3], 128  }
   0x9   :  { %184 = vsyncadd [#allocation3], 4294967168 }
   0xa   :  { %185 = dma.done.wait [#allocation6], 2048  }
   0xb   :  { %186 = vsyncadd [#allocation6], 4294965248  ;;  %v61_v0 = vld [vmem:[#allocation5 + $0x78] sm:$0xff]  ;;  %v60_v1 = vld [vmem:[#allocation5 + $0x70] sm:$0xff]  ;;  %s193_s24 = smov [#allocation7]   ;;  %s94_s28 = sshll.u32 %s229_s3, 4  ;;  %s95_s28 = int_to_ptr.hbm [resolvable:$true] %s94_s28 }
   0xc   :  { %66 = vmatpush.xpose.msra.mxu0 %v61_v0  ;;  %v59_v2 = vld [vmem:[#allocation5 + $0x68] sm:$0xff]  ;;  %v58_v3 = vld [vmem:[#allocation5 + $0x60] sm:$0xff]  ;;  %v57_v4 = vld [vmem:[#allocation5 + $0x58] sm:$0xff]  ;;  %s92_s25 = sshll.u32 %s193_s24, 4  ;;  %s93_s25 = int_to_ptr.vmem [resolvable:$true] %s92_s25 }
   0xd   :  { %v56_v5 = vld [vmem:[#allocation5 + $0x50] sm:$0xff]  ;;  %v55_v6 = vld [vmem:[#allocation5 + $0x48] sm:$0xff]  ;;  %v54_v7 = vld [vmem:[#allocation5 + $0x40] sm:$0xff] }
   0xe   :  { %v53_v8 = vld [vmem:[#allocation5 + $0x38] sm:$0xff]  ;;  %v52_v9 = vld [vmem:[#allocation5 + $0x30] sm:$0xff]  ;;  %v51_v10 = vld [vmem:[#allocation5 + $0x28] sm:$0xff] }
   0xf   :  { %v50_v11 = vld [vmem:[#allocation5 + $0x20] sm:$0xff]  ;;  %v49_v12 = vld [vmem:[#allocation5 + $0x18] sm:$0xff]  ;;  %v48_v13 = vld [vmem:[#allocation5 + $0x10] sm:$0xff] }
  0x10   :  { %67 = vmatpush.xpose.msra.mxu0 %v60_v1  ;;  %v47_v14 = vld [vmem:[#allocation5 + $0x8] sm:$0xff]  ;;  %v46_v15 = vld [vmem:[#allocation5] sm:$0xff]  ;;  %v45_v16 = vld [vmem:[#allocation2] sm:$0xff] }
  0x11   :  { %v110_v17 = vld [vmem:[%s228_s2] ss:$0 sm:$0xff] }
  0x14   :  { %68 = vmatpush.xpose.msra.mxu0 %v59_v2 }
  0x18   :  { %69 = vmatpush.xpose.msra.mxu0 %v58_v3 }
  0x1c   :  { %70 = vmatpush.xpose.msra.mxu0 %v57_v4 }
  0x20   :  { %71 = vmatpush.xpose.msra.mxu0 %v56_v5 }
  0x24   :  { %72 = vmatpush.xpose.msra.mxu0 %v55_v6 }
  0x28   :  { %73 = vmatpush.xpose.msra.mxu0 %v54_v7 }
  0x2c   :  { %74 = vmatpush.xpose.msra.mxu0 %v53_v8 }
  0x30   :  { %75 = vmatpush.xpose.msra.mxu0 %v52_v9 }
  0x34   :  { %76 = vmatpush.xpose.msra.mxu0 %v51_v10 }
  0x38   :  { %77 = vmatpush.xpose.msra.mxu0 %v50_v11 }
  0x3c   :  { %78 = vmatpush.xpose.msra.mxu0 %v49_v12 }
  0x40   :  { %79 = vmatpush.xpose.msra.mxu0 %v48_v13 }
  0x44   :  { %80 = vmatpush.xpose.msra.mxu0 %v47_v14 }
  0x48   :  { %81 = vmatpush.xpose.msra.mxu0 %v46_v15 }
  0x4b   :  { %82 = vmatmul.f32.vlgmr.msra.gmra.mxu0 %v45_v16 }
  0xc8   :  { %v83_v18 = vpop.f32.mrf.mxu0 }
  0xc9   :  { %v84_v19 = vadd.f32 %v110_v17, %v83_v18 }
  0xcb   :  { %86 = vst [vmem:[#allocation7] sm:$0xff] %v84_v19 }
  0xcc   :  { %97 = dma.vmem_to_hbm [thread:$0]  %s93_s25, 128, %s95_s28, [#allocation4]  }
  0xcd   :  { %187 = dma.done.wait [#allocation4], 128  }
  0xce   :  { %188 = vsyncadd [#allocation4], 4294967168 }
  0xcf   :  { %102 = vsyncpa [#allocation3], 1 }
  0xd0   :  { %103 = vsyncpa [#allocation6], 1 }
  0xd1   :  { %104 = vsyncpa [#allocation4], 1 }

</bundles_post_ra>
